<compile_context>
chip_gen: v7x
topology: tpu7x:2x2x1
jax: 0.10.0
libtpu: 0.0.40
codegen_flags: <defaults>
</compile_context>

<pallas_src>
import functools

import jax
import jax.numpy as jnp
from jax.experimental import pallas as pl
from jax.experimental.pallas import tpu as pltpu


_FAST_PATH_BYTES = 512 * 1024           # below this, plain XLA transpose wins
_VMEM_BUDGET_BYTES = 12 * 1024 * 1024   # padded, double-buffered footprint target
_VMEM_LIMIT_BYTES = 32 * 1024 * 1024    # explicit scoped-VMEM limit (safe on all gens)


def _round_up(v, m):
    return ((v + m - 1) // m) * m


def _round_down(v, m):
    return (v // m) * m


def _permute_kernel(x_ref, o_ref, *, C, T):
    """x_ref: (tile_hw, C*T) block, col = c*T + t.
       o_ref: (T*C, tile_hw) block, row = t*C + c."""
    # Single 2-D transpose; afterwards every row is lane-dense (tile_hw wide).
    y = jnp.transpose(x_ref[...], (1, 0))            # (C*T, tile_hw)
    if C == 1 or T == 1:
        # (c,t) -> (t,c) is the identity permutation.
        o_ref[...] = y
        return
    # (c,t) -> (t,c) reorder on the sublane side via static row copies (C*T is
    # a small compile-time constant), then ONE full-block lane-dense store.
    rows = [y[c * T + t : c * T + t + 1, :] for t in range(T) for c in range(C)]
    o_ref[...] = jnp.concatenate(rows, axis=0)


def _pick_tile_hw(HW, CT, itemsize):
    """Largest multiple-of-128 HW tile whose *padded* VMEM footprint fits budget."""
    lane_ct = _round_up(CT, 128)   # input block lane axis pads to 128
    sub_tc = _round_up(CT, 8)      # output block sublane axis pads to 8
    # Per HW row: 2x double-buffered input + 1 loaded value (lane-padded), and
    # 2x double-buffered output + ~2 value temporaries (transpose + reorder).
    bytes_per_row = (3 * lane_ct + 4 * sub_tc) * itemsize
    tile = max(128, _round_down(_VMEM_BUDGET_BYTES // bytes_per_row, 128))
    # Guarantee >= 2 grid steps so the "parallel" HW axis can shard across
    # v7x's two TensorCores (costs nothing on single-TC v5e/v6e).
    tile = min(tile, _round_up(pl.cdiv(HW, 2), 128))
    return tile


def to_tensor_3d(x, *, force_pallas=False):
    """Pallas equivalent of ToTensor3D.forward: (H, W, C, T) -> (T, C, H, W)."""
    H, W, C, T = x.shape
    HW, CT = H * W, C * T

    # Fast path: for tiny tensors, kernel-call + DMA setup overhead dwarfs the
    # copy.  Also used when HW is too small to form two lane-dense tiles.
    small = x.size * x.dtype.itemsize < _FAST_PATH_BYTES
    if (small and not force_pallas) or HW < 256 or CT == 0:
        return jnp.transpose(x, (3, 2, 0, 1))

    # Free row-major view: element (h, w, c, t) -> row h*W + w, col c*T + t.
    x2 = x.reshape(HW, CT)

    tile_hw = _pick_tile_hw(HW, CT, x.dtype.itemsize)
    grid = (pl.cdiv(HW, tile_hw),)   # ragged tail: reads padded, writes masked

    kernel = functools.partial(_permute_kernel, C=C, T=T)

    out2 = pl.pallas_call(
        kernel,
        out_shape=jax.ShapeDtypeStruct((T * C, HW), x.dtype),
        grid=grid,
        # Input tiles are fully contiguous in HBM; add pipeline_mode=
        # pl.Buffered(3) here only if profiling shows exposed DMA.
        in_specs=[pl.BlockSpec((tile_hw, CT), lambda i: (i, 0))],
        out_specs=pl.BlockSpec((T * C, tile_hw), lambda i: (0, i)),
        compiler_params=pltpu.CompilerParams(
            dimension_semantics=("parallel",),
            vmem_limit_bytes=_VMEM_LIMIT_BYTES,
        ),
        cost_estimate=pl.CostEstimate(
            flops=0,
            transcendentals=0,
            bytes_accessed=2 * x.size * x.dtype.itemsize,
        ),
    )(x2)

    # Free reshape back: row t*C + c, col h*W + w -> (t, c, h, w).
    return out2.reshape(T, C, H, W)


if __name__ == "__main__":
    key = jax.random.PRNGKey(0)
    k0, k1, k2 = jax.random.split(key, 3)

    # 1) Shipped tiny shape (H=W=16, C=4, T=2): takes the XLA fast path.
    x_small = jax.random.normal(k0, (16, 16, 4, 2), dtype=jnp.float32)
    y_small = jax.block_until_ready(to_tensor_3d(x_small))
    assert y_small.shape == (2, 4, 16, 16), y_small.shape
    assert y_small.dtype == x_small.dtype
    assert bool(jnp.array_equal(y_small, jnp.transpose(x_small, (3, 2, 0, 1))))

    # 2) Same layout, larger spatial extent, forced through the Pallas kernel
    #    (two lane-dense grid steps over HW).
    x = jax.random.normal(k1, (32, 32, 4, 2), dtype=jnp.float32)
    y = jax.block_until_ready(to_tensor_3d(x, force_pallas=True))
    assert y.shape == (2, 4, 32, 32), y.shape
    assert y.dtype == x.dtype
    assert bool(jnp.array_equal(y, jnp.transpose(x, (3, 2, 0, 1))))

    # 3) Ragged HW and non-power-of-two C, T through the Pallas kernel
    #    (exercises the masked tail block).
    x_r = jax.random.normal(k2, (24, 20, 3, 5), dtype=jnp.float32)
    y_r = jax.block_until_ready(to_tensor_3d(x_r, force_pallas=True))
    assert y_r.shape == (5, 3, 24, 20), y_r.shape
    assert bool(jnp.array_equal(y_r, jnp.transpose(x_r, (3, 2, 0, 1))))

    print("KERNEL_OK")
</pallas_src>

<mosaic_0001>
module attributes {stable_mosaic.version = 11 : i64} {
  func.func @_permute_kernel(%arg0: i32, %arg1: memref<512x8xf32, #tpu.memory_space<vmem>>, %arg2: memref<8x512xf32, #tpu.memory_space<vmem>>) attributes {dimension_semantics = [#tpu.dimension_semantics<parallel>], iteration_bounds = array<i64: 2>, scalar_prefetch = 0 : i64, scratch_operands = 0 : i64, tpu.core_type = #tpu.core_type<tc>, window_params = [{transform_indices = @transform_0, window_bounds = array<i64: 512, 8>}, {transform_indices = @transform_1, window_bounds = array<i64: 8, 512>}]} {
    %c0 = arith.constant 0 : index
    %c0_0 = arith.constant 0 : index
    %0 = vector.load %arg1[%c0, %c0_0] : memref<512x8xf32, #tpu.memory_space<vmem>>, vector<512x8xf32>
    %1 = tpu.transpose %0, [1, 0] : vector<512x8xf32> -> vector<8x512xf32>
    %2 = vector.extract_strided_slice %1 {offsets = [0, 0], sizes = [1, 512], strides = [1, 1]} : vector<8x512xf32> to vector<1x512xf32>
    %3 = vector.extract_strided_slice %1 {offsets = [2, 0], sizes = [1, 512], strides = [1, 1]} : vector<8x512xf32> to vector<1x512xf32>
    %4 = vector.extract_strided_slice %1 {offsets = [4, 0], sizes = [1, 512], strides = [1, 1]} : vector<8x512xf32> to vector<1x512xf32>
    %5 = vector.extract_strided_slice %1 {offsets = [6, 0], sizes = [1, 512], strides = [1, 1]} : vector<8x512xf32> to vector<1x512xf32>
    %6 = vector.extract_strided_slice %1 {offsets = [1, 0], sizes = [1, 512], strides = [1, 1]} : vector<8x512xf32> to vector<1x512xf32>
    %7 = vector.extract_strided_slice %1 {offsets = [3, 0], sizes = [1, 512], strides = [1, 1]} : vector<8x512xf32> to vector<1x512xf32>
    %8 = vector.extract_strided_slice %1 {offsets = [5, 0], sizes = [1, 512], strides = [1, 1]} : vector<8x512xf32> to vector<1x512xf32>
    %9 = vector.extract_strided_slice %1 {offsets = [7, 0], sizes = [1, 512], strides = [1, 1]} : vector<8x512xf32> to vector<1x512xf32>
    %10 = tpu.concatenate %2, %3, %4, %5, %6, %7, %8, %9 in 0 : vector<1x512xf32>, vector<1x512xf32>, vector<1x512xf32>, vector<1x512xf32>, vector<1x512xf32>, vector<1x512xf32>, vector<1x512xf32>, vector<1x512xf32> -> vector<8x512xf32>
    %c0_1 = arith.constant 0 : index
    %c0_2 = arith.constant 0 : index
    %11 = vector.load %arg2[%c0_1, %c0_2] : memref<8x512xf32, #tpu.memory_space<vmem>>, vector<8x512xf32>
    tpu.vector_store %arg2[%c0_1, %c0_2], %10 {strides = array<i32>} : memref<8x512xf32, #tpu.memory_space<vmem>>, vector<8x512xf32>,
    return
  }
  func.func @transform_0(%arg0: i32) -> (i32, i32) {
    %c0_i32 = arith.constant 0 : i32
    %c0_i32_0 = arith.constant 0 : i32
    return %arg0, %c0_i32 : i32, i32
  }
  func.func @transform_1(%arg0: i32) -> (i32, i32) {
    %c0_i32 = arith.constant 0 : i32
    %c0_i32_0 = arith.constant 0 : i32
    return %c0_i32, %arg0 : i32, i32
  }
}

</mosaic_0001>

<bundles_post_ra>
// kernel: tpu_custom_call.1
= control target key start
LH: loop header
LB: loop body
LE: loop exit
PB: predicated region body
PF: predicated region fallthrough
CT: control target
= control target key end

     0   :  { %6 = vsyncpa [#allocation3], 0  ;;  %s806_s0 = inlined_call_operand.vmem [shape: f32[1024,8], index: 0, kind: input, shape index: {}]   ;;  %s807_s1 = inlined_call_operand.hbm [shape: f32[8,1024], index: 1, kind: output, shape index: {}]  }
   0x1   :  { %8 = vsyncpa [#allocation3 + $0x1], 0  ;;  %s602_s6 = smov 0   ;;  %s604_s7 = smov 0  }
   0x2   :  { %s606_s8 = smov 0   ;;  %s608_s9 = smov 0  }
   0x3 LB: > { %s623_s10 = sadd.s32 4294967295, %s589_s9   ;;  %s475_s11 = sadd.s32 4294967294, %s589_s9   ;;  %s589_s9 = sphi %s608_s9, %s813_s9   ;;  %s585_s8 = sphi %s606_s8, %s812_s8   ;;  %s581_s7 = sphi %s604_s7, %s811_s7   ;;  %s577_s6 = sphi %s602_s6, %s810_s6  }
   0x4   : > { %s627_s12 = sadd.s32 1, %s589_s9   ;;  %s47_s13 = sadd.s32 1, %s585_s8 }
   0x5   : > { %s44_s14 = ssub.s32 %s589_s9, %s627_s12  ;;  %p57_p0 = scmp.ne.s32.totalorder %s585_s8, %s581_s7 }
   0x6   : > { %p45_p1 = scmp.eq.s32.totalorder %s44_s14, 0  ;;  %p58_p2 = scmp.eq.s32.totalorder %s623_s10, 1 }
   0x7   : > { %p63_p3 = scmp.ne.s32.totalorder %s581_s7, %s577_s6  ;;  %p64_p4 = scmp.eq.s32.totalorder %s475_s11, 1 }
   0x8   : > { %s638_s15 = scalar_select %p45_p1, %s585_s8, %s47_s13  }
   0x9   : > { %p640_p5 = por %p58_p2, %p57_p0  ;;  %p644_p6 = por %p64_p4, %p63_p3 }
   0xa   : > { %p478_p7 = scmp.ge.s32.totalorder %s589_s9, 1  ;;  %p91_p8 = scmp.lt.s32.totalorder %s589_s9, 3 }
   0xc   : > { %p92_p9 = pnand %p478_p7, %p91_p8 }
   0xd   : > { %s480_s18 = sshll.u32 (!%p92_p9), %s623_s10, 6  ;;  %vm362_vm0 = vcmask (!%p92_p9), 1040384   ;;  %vm367_vm1 = vcmask (!%p92_p9), 1041408   ;;  %vm372_vm2 = vcmask (!%p92_p9), 1042432   ;;  %s108_s23 = sand.u32 (!%p92_p9), 1, %s581_s7   ;;  %vm377_vm3 = vcmask (!%p92_p9), 1043456  }
   0xe   : > { %95 = sbr.rel (%p92_p9) target bundleno = 242 (0xf2), region = 24  ;;  %p112_p10 = scmp.lt.s32.totalorder (!%p92_p9), %s480_s18, 127  ;;  %vm382_vm4 = vcmask (!%p92_p9), 1044480   ;;  %vm387_vm5 = vcmask (!%p92_p9), 1045504   ;;  %vm392_vm6 = vcmask (!%p92_p9), 1046528  }
   0xf   : > { %s479_s24 = sshll.u32 (!%p92_p9), %s108_s23, 5  ;;  %s487_s26 = sshll.u32 (!%p92_p9), %s623_s10, 9 }
  0x10   : > { %s737_s25 = scalar_lea.vmem (!%p92_p9), [#allocation2], %s479_s24  ;;  %s759_s30 = scalar_lea.hbm (!%p92_p9), %s807_s1, %s487_s26 }
  0x11   : > { %s416_s27 = sshll.u32 (!%p92_p9), %s737_s25, 4  ;;  %s402_s2 = scalar_lea.sflag (!%p92_p9), [#allocation3], %s108_s23  ;;  %s761_s27 = int_to_ptr.vmem [resolvable:$true] %s416_s27 }
  0x12   : > { %s527_s3 = scalar_lea.vmem (!%p92_p9), %s761_s27, 512  ;;  %s591_s4 = smov (!%p92_p9), [#allocation2]  }
  0x13   : > { %p528_p11 = scmp.ne.s32.totalorder (!%p92_p9), %s761_s27, %s527_s3  ;;  %s531_s5 = sshll.u32 (!%p92_p9), %s591_s4, 4  ;;  %s532_s5 = int_to_ptr.vmem [resolvable:$false] %s531_s5 }
  0x14   : > { %s533_s10 = scalar_lea.vmem (!%p92_p9), %s532_s5, 1024  ;;  %p534_p0 = scmp.lt.s32.totalorder (!%p92_p9), %s761_s27, %s532_s5 }
  0x15   : > { %s815_s18 = smov (!%p112_p10, %s480_s18), 127  ;;  %p529_p12 = pnand %p528_p11, %p640_p5 }
  0x16   : > { %s481_s19 = sshll.u32 %s815_s18, 3  ;;  %p535_p1 = scmp.lt.s32.totalorder %s533_s10, %s527_s3 }
  0x17   : > { %s654_s22 = scalar_lea.vmem %s806_s0, %s481_s19  ;;  %p530_p13 = pneg %p529_p12 }
  0x18   : > { %v134_v0 = vld [vmem:[%s654_s22 + $0x80] sm:$0xff]  ;;  %v135_v2 = vld [vmem:[%s654_s22 + $0x88] sm:$0xff]  ;;  %v136_v4 = vld [vmem:[%s654_s22 + $0x90] sm:$0xff]  ;;  %p536_p2 = por %p535_p1, %p534_p0 }
  0x19   : > { %v118_v1 = vld [vmem:[%s654_s22] sm:$0xff]  ;;  %214 = vxpose.xlu1.b32.start [1/16] (narrow) %v134_v0, 8  ;;  %v119_v3 = vld [vmem:[%s654_s22 + $0x8] sm:$0xff]  ;;  %v120_v5 = vld [vmem:[%s654_s22 + $0x10] sm:$0xff] }
  0x1a   : > { %182 = vxpose.xlu0.b32.start [1/16] (narrow) %v118_v1, 8  ;;  %v137_v6 = vld [vmem:[%s654_s22 + $0x98] sm:$0xff]  ;;  %v138_v8 = vld [vmem:[%s654_s22 + $0xa0] sm:$0xff]  ;;  %v139_v10 = vld [vmem:[%s654_s22 + $0xa8] sm:$0xff]  ;;  %p537_p3 = pnand %p536_p2, %p530_p13 }
  0x1b   : > { %v121_v7 = vld [vmem:[%s654_s22 + $0x18] sm:$0xff]  ;;  %v122_v9 = vld [vmem:[%s654_s22 + $0x20] sm:$0xff]  ;;  %v123_v11 = vld [vmem:[%s654_s22 + $0x28] sm:$0xff] }
  0x1c   : > { %v140_v12 = vld [vmem:[%s654_s22 + $0xb0] sm:$0xff]  ;;  %v141_v14 = vld [vmem:[%s654_s22 + $0xb8] sm:$0xff]  ;;  %v142_v16 = vld [vmem:[%s654_s22 + $0xc0] sm:$0xff] }
  0x1d   : > { %215 = vxpose.xlu1.b32.cont [2/16] (narrow) %v135_v2, 8  ;;  %v124_v13 = vld [vmem:[%s654_s22 + $0x30] sm:$0xff]  ;;  %v125_v15 = vld [vmem:[%s654_s22 + $0x38] sm:$0xff]  ;;  %v126_v17 = vld [vmem:[%s654_s22 + $0x40] sm:$0xff] }
  0x1e   : > { %183 = vxpose.xlu0.b32.cont [2/16] (narrow) %v119_v3, 8  ;;  %v143_v18 = vld [vmem:[%s654_s22 + $0xc8] sm:$0xff]  ;;  %v144_v20 = vld [vmem:[%s654_s22 + $0xd0] sm:$0xff]  ;;  %v145_v22 = vld [vmem:[%s654_s22 + $0xd8] sm:$0xff] }
  0x1f   : > { %v127_v19 = vld [vmem:[%s654_s22 + $0x48] sm:$0xff]  ;;  %v128_v21 = vld [vmem:[%s654_s22 + $0x50] sm:$0xff]  ;;  %v129_v23 = vld [vmem:[%s654_s22 + $0x58] sm:$0xff] }
  0x20   : > { %v146_v24 = vld [vmem:[%s654_s22 + $0xe0] sm:$0xff]  ;;  %v147_v26 = vld [vmem:[%s654_s22 + $0xe8] sm:$0xff]  ;;  %v148_v28 = vld [vmem:[%s654_s22 + $0xf0] sm:$0xff] }
  0x21   : > { %216 = vxpose.xlu1.b32.cont [3/16] (narrow) %v136_v4, 8  ;;  %v130_v25 = vld [vmem:[%s654_s22 + $0x60] sm:$0xff]  ;;  %v131_v27 = vld [vmem:[%s654_s22 + $0x68] sm:$0xff]  ;;  %v132_v29 = vld [vmem:[%s654_s22 + $0x70] sm:$0xff] }
  0x22   : > { %184 = vxpose.xlu0.b32.cont [3/16] (narrow) %v120_v5, 8  ;;  %v149_v30 = vld [vmem:[%s654_s22 + $0xf8] sm:$0xff]  ;;  %v166_v32 = vld [vmem:[%s654_s22 + $0x180] sm:$0xff]  ;;  %v167_v34 = vld [vmem:[%s654_s22 + $0x188] sm:$0xff] }
  0x23   : > { %v133_v31 = vld [vmem:[%s654_s22 + $0x78] sm:$0xff]  ;;  %v150_v33 = vld [vmem:[%s654_s22 + $0x100] sm:$0xff]  ;;  %v151_v35 = vld [vmem:[%s654_s22 + $0x108] sm:$0xff] }
  0x24   : > { %v168_v36 = vld [vmem:[%s654_s22 + $0x190] sm:$0xff]  ;;  %v169_v38 = vld [vmem:[%s654_s22 + $0x198] sm:$0xff]  ;;  %v170_v40 = vld [vmem:[%s654_s22 + $0x1a0] sm:$0xff] }
  0x25   : > { %217 = vxpose.xlu1.b32.cont [4/16] (narrow) %v137_v6, 8  ;;  %v152_v37 = vld [vmem:[%s654_s22 + $0x110] sm:$0xff]  ;;  %v153_v39 = vld [vmem:[%s654_s22 + $0x118] sm:$0xff]  ;;  %v154_v41 = vld [vmem:[%s654_s22 + $0x120] sm:$0xff] }
  0x26   : > { %185 = vxpose.xlu0.b32.cont [4/16] (narrow) %v121_v7, 8  ;;  %v171_v42 = vld [vmem:[%s654_s22 + $0x1a8] sm:$0xff]  ;;  %v172_v44 = vld [vmem:[%s654_s22 + $0x1b0] sm:$0xff]  ;;  %v173_v46 = vld [vmem:[%s654_s22 + $0x1b8] sm:$0xff] }
  0x27   : > { %v155_v43 = vld [vmem:[%s654_s22 + $0x128] sm:$0xff]  ;;  %v156_v45 = vld [vmem:[%s654_s22 + $0x130] sm:$0xff]  ;;  %v157_v47 = vld [vmem:[%s654_s22 + $0x138] sm:$0xff] }
  0x28   : > { %v174_v48 = vld [vmem:[%s654_s22 + $0x1c0] sm:$0xff]  ;;  %v175_v50 = vld [vmem:[%s654_s22 + $0x1c8] sm:$0xff]  ;;  %v176_v52 = vld [vmem:[%s654_s22 + $0x1d0] sm:$0xff] }
  0x29   : > { %218 = vxpose.xlu1.b32.cont [5/16] (narrow) %v138_v8, 8  ;;  %v158_v49 = vld [vmem:[%s654_s22 + $0x140] sm:$0xff]  ;;  %v159_v51 = vld [vmem:[%s654_s22 + $0x148] sm:$0xff]  ;;  %v160_v53 = vld [vmem:[%s654_s22 + $0x150] sm:$0xff] }
  0x2a   : > { %186 = vxpose.xlu0.b32.cont [5/16] (narrow) %v122_v9, 8  ;;  %v177_v54 = vld [vmem:[%s654_s22 + $0x1d8] sm:$0xff]  ;;  %v178_v56 = vld [vmem:[%s654_s22 + $0x1e0] sm:$0xff]  ;;  %v179_v58 = vld [vmem:[%s654_s22 + $0x1e8] sm:$0xff] }
  0x2b   : > { %v161_v55 = vld [vmem:[%s654_s22 + $0x158] sm:$0xff]  ;;  %v162_v57 = vld [vmem:[%s654_s22 + $0x160] sm:$0xff]  ;;  %v163_v59 = vld [vmem:[%s654_s22 + $0x168] sm:$0xff] }
  0x2c   : > { %v180_v60 = vld [vmem:[%s654_s22 + $0x1f0] sm:$0xff]  ;;  %v181_v62 = vld [vmem:[%s654_s22 + $0x1f8] sm:$0xff] }
  0x2d   : > { %219 = vxpose.xlu1.b32.cont [6/16] (narrow) %v139_v10, 8  ;;  %v164_v61 = vld [vmem:[%s654_s22 + $0x170] sm:$0xff]  ;;  %v165_v63 = vld [vmem:[%s654_s22 + $0x178] sm:$0xff] }
  0x2e   : > { %187 = vxpose.xlu0.b32.cont [6/16] (narrow) %v123_v11, 8 }
  0x31   : > { %220 = vxpose.xlu1.b32.cont [7/16] (narrow) %v140_v12, 8 }
  0x32   : > { %188 = vxpose.xlu0.b32.cont [7/16] (narrow) %v124_v13, 8 }
  0x35   : > { %221 = vxpose.xlu1.b32.cont [8/16] (narrow) %v141_v14, 8 }
  0x36   : > { %189 = vxpose.xlu0.b32.cont [8/16] (narrow) %v125_v15, 8 }
  0x39   : > { %222 = vxpose.xlu1.b32.cont [9/16] (narrow) %v142_v16, 8 }
  0x3a   : > { %190 = vxpose.xlu0.b32.cont [9/16] (narrow) %v126_v17, 8 }
  0x3d   : > { %223 = vxpose.xlu1.b32.cont [10/16] (narrow) %v143_v18, 8 }
  0x3e   : > { %191 = vxpose.xlu0.b32.cont [10/16] (narrow) %v127_v19, 8 }
  0x41   : > { %224 = vxpose.xlu1.b32.cont [11/16] (narrow) %v144_v20, 8 }
  0x42   : > { %192 = vxpose.xlu0.b32.cont [11/16] (narrow) %v128_v21, 8 }
  0x45   : > { %225 = vxpose.xlu1.b32.cont [12/16] (narrow) %v145_v22, 8 }
  0x46   : > { %193 = vxpose.xlu0.b32.cont [12/16] (narrow) %v129_v23, 8 }
  0x49   : > { %226 = vxpose.xlu1.b32.cont [13/16] (narrow) %v146_v24, 8 }
  0x4a   : > { %194 = vxpose.xlu0.b32.cont [13/16] (narrow) %v130_v25, 8 }
  0x4d   : > { %227 = vxpose.xlu1.b32.cont [14/16] (narrow) %v147_v26, 8 }
  0x4e   : > { %195 = vxpose.xlu0.b32.cont [14/16] (narrow) %v131_v27, 8 }
  0x51   : > { %228 = vxpose.xlu1.b32.cont [15/16] (narrow) %v148_v28, 8 }
  0x52   : > { %196 = vxpose.xlu0.b32.cont [15/16] (narrow) %v132_v29, 8 }
  0x55   : > { %229 = vxpose.xlu1.b32.end [16/16] (narrow) %v149_v30, 8 }
  0x56   : > { %197 = vxpose.xlu0.b32.end [16/16] (narrow) %v133_v31, 8 }
  0x59   : > { %278 = vxpose.xlu1.b32.start [1/16] (narrow) %v166_v32, 8 }
  0x5a   : > { %246 = vxpose.xlu0.b32.start [1/16] (narrow) %v150_v33, 8 }
  0x5d   : > { %279 = vxpose.xlu1.b32.cont [2/16] (narrow) %v167_v34, 8 }
  0x5e   : > { %247 = vxpose.xlu0.b32.cont [2/16] (narrow) %v151_v35, 8 }
  0x61   : > { %280 = vxpose.xlu1.b32.cont [3/16] (narrow) %v168_v36, 8 }
  0x62   : > { %248 = vxpose.xlu0.b32.cont [3/16] (narrow) %v152_v37, 8 }
  0x65   : > { %281 = vxpose.xlu1.b32.cont [4/16] (narrow) %v169_v38, 8 }
  0x66   : > { %249 = vxpose.xlu0.b32.cont [4/16] (narrow) %v153_v39, 8 }
  0x69   : > { %282 = vxpose.xlu1.b32.cont [5/16] (narrow) %v170_v40, 8 }
  0x6a   : > { %250 = vxpose.xlu0.b32.cont [5/16] (narrow) %v154_v41, 8 }
  0x6d   : > { %283 = vxpose.xlu1.b32.cont [6/16] (narrow) %v171_v42, 8 }
  0x6e   : > { %251 = vxpose.xlu0.b32.cont [6/16] (narrow) %v155_v43, 8 }
  0x71   : > { %284 = vxpose.xlu1.b32.cont [7/16] (narrow) %v172_v44, 8 }
  0x72   : > { %252 = vxpose.xlu0.b32.cont [7/16] (narrow) %v156_v45, 8 }
  0x75   : > { %285 = vxpose.xlu1.b32.cont [8/16] (narrow) %v173_v46, 8 }
  0x76   : > { %253 = vxpose.xlu0.b32.cont [8/16] (narrow) %v157_v47, 8 }
  0x79   : > { %286 = vxpose.xlu1.b32.cont [9/16] (narrow) %v174_v48, 8 }
  0x7a   : > { %254 = vxpose.xlu0.b32.cont [9/16] (narrow) %v158_v49, 8 }
  0x7d   : > { %287 = vxpose.xlu1.b32.cont [10/16] (narrow) %v175_v50, 8 }
  0x7e   : > { %255 = vxpose.xlu0.b32.cont [10/16] (narrow) %v159_v51, 8 }
  0x81   : > { %288 = vxpose.xlu1.b32.cont [11/16] (narrow) %v176_v52, 8 }
  0x82   : > { %256 = vxpose.xlu0.b32.cont [11/16] (narrow) %v160_v53, 8 }
  0x85   : > { %289 = vxpose.xlu1.b32.cont [12/16] (narrow) %v177_v54, 8 }
  0x86   : > { %257 = vxpose.xlu0.b32.cont [12/16] (narrow) %v161_v55, 8 }
  0x89   : > { %290 = vxpose.xlu1.b32.cont [13/16] (narrow) %v178_v56, 8 }
  0x8a   : > { %258 = vxpose.xlu0.b32.cont [13/16] (narrow) %v162_v57, 8 }
  0x8d   : > { %291 = vxpose.xlu1.b32.cont [14/16] (narrow) %v179_v58, 8 }
  0x8e   : > { %259 = vxpose.xlu0.b32.cont [14/16] (narrow) %v163_v59, 8 }
  0x91   : > { %292 = vxpose.xlu1.b32.cont [15/16] (narrow) %v180_v60, 8 }
  0x92   : > { %260 = vxpose.xlu0.b32.cont [15/16] (narrow) %v164_v61, 8 }
  0x95   : > { %293 = vxpose.xlu1.b32.end [16/16] (narrow) %v181_v62, 8 }
  0x96   : > { %261 = vxpose.xlu0.b32.end [16/16] (narrow) %v165_v63, 8 }
  0x99   : > { %v230_v0 = vpop.trf.xlu1 }
  0x9a   : > { %v198_v1 = vpop.trf.xlu0  ;;  %v315_v2 = vrot.slane %v230_v0, 1  ;;  %v323_v3 = vrot.slane %v230_v0, 2  ;;  %v331_v4 = vrot.slane %v230_v0, 3  ;;  %v339_v5 = vrot.slane %v230_v0, 5 }
  0x9b   : > { %v314_v6 = vrot.slane %v198_v1, 1  ;;  %v322_v7 = vrot.slane %v198_v1, 2  ;;  %v330_v8 = vrot.slane %v198_v1, 3  ;;  %v347_v9 = vrot.slane %v230_v0, 6 }
  0x9c   : > { %v338_v10 = vrot.slane %v198_v1, 5  ;;  %v364_v11 = vsel %vm362_vm0, %v230_v0, %v315_v2  ;;  %v346_v12 = vrot.slane %v198_v1, 6  ;;  %v355_v14 = vrot.slane %v230_v0, 7 }
  0x9d   : > { %v363_v13 = vsel %vm362_vm0, %v198_v1, %v314_v6  ;;  %v369_v15 = vsel %vm367_vm1, %v364_v11, %v323_v3  ;;  %v354_v16 = vrot.slane %v198_v1, 7 }
  0x9e   : > { %v368_v17 = vsel %vm367_vm1, %v363_v13, %v322_v7  ;;  %v374_v18 = vsel %vm372_vm2, %v369_v15, %v331_v4 }
  0x9f   : > { %v373_v19 = vsel %vm372_vm2, %v368_v17, %v330_v8  ;;  %v379_v20 = vsel %vm377_vm3, %v374_v18, %v339_v5 }
  0xa0   : > { %v378_v21 = vsel %vm377_vm3, %v373_v19, %v338_v10  ;;  %v384_v22 = vsel %vm382_vm4, %v379_v20, %v347_v9 }
  0xa1   : > { %v383_v23 = vsel %vm382_vm4, %v378_v21, %v346_v12  ;;  %v389_v24 = vsel %vm387_vm5, %v384_v22, %v355_v14 }
  0xa2   : > { %v388_v25 = vsel %vm387_vm5, %v383_v23, %v354_v16  ;;  %v394_v26 = vsel %vm392_vm6, %v389_v24, %v230_v0 }
  0xa3   : > { %v393_v27 = vsel %vm392_vm6, %v388_v25, %v198_v1  ;;  %398 = vst [vmem:[%s737_s25 + $0x8] sm:$0xff] %v394_v26 }
  0xa4   : > { %397 = vst [vmem:[%s737_s25] sm:$0xff] %v393_v27 }
  0xd9   : > { %v294_v28 = vpop.trf.xlu1 }
  0xda   : > { %v262_v29 = vpop.trf.xlu0  ;;  %v317_v30 = vrot.slane %v294_v28, 1  ;;  %v325_v31 = vrot.slane %v294_v28, 2  ;;  %v333_v34 = vrot.slane %v294_v28, 3  ;;  %v341_v36 = vrot.slane %v294_v28, 5 }
  0xdb   : > { %v316_v32 = vrot.slane %v262_v29, 1  ;;  %v324_v33 = vrot.slane %v262_v29, 2  ;;  %v332_v38 = vrot.slane %v262_v29, 3  ;;  %v349_v40 = vrot.slane %v294_v28, 6 }
  0xdc   : > { %v366_v35 = vsel %vm362_vm0, %v294_v28, %v317_v30  ;;  %v340_v42 = vrot.slane %v262_v29, 5  ;;  %v357_v44 = vrot.slane %v294_v28, 7  ;;  %v348_v45 = vrot.slane %v262_v29, 6 }
  0xdd   : > { %v371_v37 = vsel %vm367_vm1, %v366_v35, %v325_v31  ;;  %v365_v39 = vsel %vm362_vm0, %v262_v29, %v316_v32  ;;  %v356_v48 = vrot.slane %v262_v29, 7 }
  0xde   : > { %v376_v41 = vsel %vm372_vm2, %v371_v37, %v333_v34  ;;  %v370_v43 = vsel %vm367_vm1, %v365_v39, %v324_v33 }
  0xdf   : > { %v375_v46 = vsel %vm372_vm2, %v370_v43, %v332_v38  ;;  %v381_v47 = vsel %vm377_vm3, %v376_v41, %v341_v36 }
  0xe0   : > { %v380_v49 = vsel %vm377_vm3, %v375_v46, %v340_v42  ;;  %v386_v50 = vsel %vm382_vm4, %v381_v47, %v349_v40 }
  0xe1   : > { %v385_v51 = vsel %vm382_vm4, %v380_v49, %v348_v45  ;;  %v391_v52 = vsel %vm387_vm5, %v386_v50, %v357_v44 }
  0xe2   : > { %v390_v53 = vsel %vm387_vm5, %v385_v51, %v356_v48  ;;  %v396_v54 = vsel %vm392_vm6, %v391_v52, %v294_v28 }
  0xe3   : > { %v395_v55 = vsel %vm392_vm6, %v390_v53, %v262_v29  ;;  %400 = vst [vmem:[%s737_s25 + $0x18] sm:$0xff] %v396_v54 }
  0xe4   : > { %399 = vst [vmem:[%s737_s25 + $0x10] sm:$0xff] %v395_v55 }
  0xe5   : > { %540 = shalt.err (!%p537_p3)
}
  0xe6   : > { %s541_s11 = scalar_lea.hbm %s759_s30, 512  ;;  %s545_s18 = scalar_lea.hbm %s807_s1, 1024 }
  0xe7   : > { %p542_p4 = scmp.ne.s32.totalorder %s759_s30, %s541_s11  ;;  %p546_p9 = scmp.lt.u32.totalorder %s759_s30, %s807_s1 }
  0xe8   : > { %p547_p10 = scmp.lt.u32.totalorder %s545_s18, %s541_s11  ;;  %p549_p12 = scmp.lt.u32.totalorder %s541_s11, %s759_s30 }
  0xe9   : > { %p543_p7 = pnand %p542_p4, %p640_p5 }
  0xea   : > { %p548_p11 = por %p547_p10, %p546_p9 }
  0xeb   : > { %p544_p8 = pneg %p543_p7 }
  0xec   : > { %p550_p13 = por %p549_p12, %p548_p11 }
  0xee   : > { %p551_p0 = pnand %p550_p13, %p544_p8 }
  0xf0   : > { %554 = shalt.err (!%p551_p0)
}
  0xf1   : > { %488 = dma.vmem_to_hbm [thread:$0]  (%p640_p5), %s761_s27, 512, %s759_s30, %s402_s2  }
  0xf2 PF: > { %p494_p1 = scmp.ge.s32.totalorder %s589_s9, 2  ;;  %s428_s21 = sand.u32 1, %s577_s6  }
  0xf3   : > { %s429_s22 = scalar_lea.sflag [#allocation3], %s428_s21 }
  0xf4   : > { %p491_p2 = pnand %p494_p1, %p644_p6 }
  0xf6   : > { %572 = dma.done.wait (!%p491_p2), %s429_s22, 512  }
  0xf7   : > { %574 = vsyncadd (!%p491_p2), %s429_s22, 4294966784  ;;  %p11_p3 = scmp.ge.s32.totalorder %s627_s12, 4   ;;  %s810_s6 = smov %s581_s7 }
  0xf8   : > { %s811_s7 = smov %s585_s8  ;;  %s812_s8 = smov %s638_s15 }
  0xf9   : > { %s813_s9 = smov %s627_s12  ;;  %13 = sbr.rel (!%p11_p3) target bundleno = 3 (0x3), region = 59 }
 0x100   :  { %434 = vsyncpa [#allocation3], 1 }
 0x101   :  { %436 = vsyncpa [#allocation3 + $0x1], 1 }

</bundles_post_ra>
